<compile_context>
chip_gen: v5e
topology: v5e:2x2
jax: 0.10.0
libtpu: 0.0.40
codegen_flags: <defaults>
</compile_context>

<pallas_src>
import functools
import math

import jax
import jax.numpy as jnp
from jax.experimental import pallas as pl
from jax.experimental.pallas import tpu as pltpu


def _pe_dropout_kernel(seed_ref, x_ref, pe_ref, o_ref, *, p, train,
                       tile_rows, lane_width, keep_thresh):
    """out = dropout(x + pe); compute in the I/O dtype, hash in u32."""
    y = x_ref[...] + pe_ref[...]                # (tb, L) + (1, L) broadcast

    if train and p > 0.0:
        seed = seed_ref[0].astype(jnp.uint32)
        row0 = (pl.program_id(0) * tile_rows).astype(jnp.uint32)

        # Per-row offset computed once on a (tb, 1) column, then broadcast:
        # hoists the full-width rows*L multiply out of the per-element path.
        row_ids = jax.lax.broadcasted_iota(
            jnp.int32, (y.shape[0], 1), 0).astype(jnp.uint32)
        row_off = (row0 + row_ids) * jnp.uint32(lane_width) \
            + seed * jnp.uint32(0x9E3779B9)

        cols = jax.lax.broadcasted_iota(jnp.int32, y.shape, 1).astype(jnp.uint32)
        h = cols + row_off                      # unique 32-bit counter / element

        # Trimmed multiplicative mixer (mul / xor-shift / mul). The threshold
        # compare is dominated by the high bits, which are well mixed after
        # two multiplies; the full splitmix32 finalizer is unnecessary here.
        h = h * jnp.uint32(0x9E3779B1)
        h = h ^ (h >> 16)
        h = h * jnp.uint32(0x85EBCA6B)

        scale = jnp.asarray(1.0 / (1.0 - p), dtype=y.dtype)
        # drop iff h < p * 2^32 ; keep-mask and 1/(1-p) scale fused in one select
        y = jnp.where(h >= jnp.uint32(keep_thresh), y * scale, jnp.zeros_like(y))

    o_ref[...] = y.astype(o_ref.dtype)


def make_sinusoidal_pe(max_len, d_model, dtype=jnp.float32):
    """Deterministic sinusoidal table, identical to the PyTorch __init__."""
    position = jnp.arange(max_len, dtype=jnp.float32)[:, None]            # (L, 1)
    div_term = jnp.exp(
        jnp.arange(0, d_model, 2, dtype=jnp.float32)
        * (-math.log(10000.0) / d_model)
    )                                                                     # (D/2,)
    pe = jnp.zeros((max_len, d_model), dtype=jnp.float32)
    pe = pe.at[:, 0::2].set(jnp.sin(position * div_term))
    pe = pe.at[:, 1::2].set(jnp.cos(position * div_term))
    return pe.astype(dtype)


def positional_encoding_forward(x, pe, seed, *, p=0.1, train=True,
                                max_tile_bytes=6 * 1024 * 1024):
    """x: (B, S, D); pe: (max_len >= S, D); seed: int32 scalar for dropout.

    max_tile_bytes is per VMEM buffer; 6 MiB keeps 2x(in)+2x(out) double
    buffers ~24 MiB (safe for v7x's 64 MiB VMEM). On v5e/v6e it can be
    raised to 12-16 MiB to shave per-step overhead further.
    """
    B, S, D = x.shape
    assert pe.shape[0] >= S and pe.shape[1] == D, "pe table too short / wrong d_model"
    assert 0.0 <= p <= 1.0, f"invalid dropout p={p}"
    if train and p >= 1.0:          # PyTorch nn.Dropout(p=1.0): everything dropped
        return jnp.zeros_like(x)

    # Lane-dense flattening: last dim must be a multiple of 128 for unmasked
    # full-width stores; pad columns if a different module config breaks this.
    L = S * D
    Lp = ((L + 127) // 128) * 128
    x2 = x.reshape(B, L)
    pe2 = pe[:S].astype(x.dtype).reshape(1, L)    # pre-cast: no per-step cast
    if Lp != L:
        x2 = jnp.pad(x2, ((0, 0), (0, Lp - L)))
        pe2 = jnp.pad(pe2, ((0, 0), (0, Lp - L)))

    # The dropout hash indexes elements with a 32-bit counter.
    assert B * Lp < 2 ** 32, "dropout counter would wrap; fold a hi-word into the seed"

    # Dtype-aware sublane multiple (sub-32-bit dtypes pack along sublanes).
    itemsize = jnp.dtype(x.dtype).itemsize
    sublane = {4: 8, 2: 16, 1: 32}.get(itemsize, 8)

    # Row tile: byte cap (VMEM) AND ceil(B/2) cap (>= 2 grid steps whenever B
    # allows, so both v7x TensorCores get tiles and DMAs overlap compute).
    row_bytes = Lp * itemsize
    tb = max(1, min(B, max_tile_bytes // row_bytes))
    tb = min(tb, max(sublane, pl.cdiv(B, 2)))
    if tb < B:
        tb = max(sublane, (tb // sublane) * sublane)
    tb = min(tb, B)
    grid = (pl.cdiv(B, tb),)

    seed_arr = jnp.asarray([seed], dtype=jnp.int32)
    thresh = min(int(round(float(p) * 2.0 ** 32)), 2 ** 32 - 1)
    kernel = functools.partial(
        _pe_dropout_kernel, p=float(p), train=bool(train),
        tile_rows=tb, lane_width=Lp, keep_thresh=thresh)

    grid_spec = pltpu.PrefetchScalarGridSpec(
        num_scalar_prefetch=1,
        grid=grid,
        in_specs=[
            pl.BlockSpec((tb, Lp), lambda i, seed_ref: (i, 0)),
            pl.BlockSpec((1, Lp), lambda i, seed_ref: (0, 0)),  # pe stays resident
        ],
        out_specs=pl.BlockSpec((tb, Lp), lambda i, seed_ref: (i, 0)),
    )

    out2 = pl.pallas_call(
        kernel,
        out_shape=jax.ShapeDtypeStruct((B, Lp), x.dtype),
        grid_spec=grid_spec,
        compiler_params=pltpu.CompilerParams(
            dimension_semantics=("parallel",),   # shard row tiles across TCs (v7x)
            vmem_limit_bytes=48 * 1024 * 1024,   # above 16/32 MiB scoped defaults,
        ),                                       # below v7x's 64 MiB physical
    )(seed_arr, x2, pe2)

    if Lp != L:
        out2 = out2[:, :L]
    return out2.reshape(B, S, D)


if __name__ == "__main__":
    # Module config: d_model=32, max_len=40, dropout p=0.1.
    # The PyTorch forward requires x.size(1) == max_len for the broadcast add.
    B, S, D = 2, 40, 32
    MAX_LEN = 40
    P_DROP = 0.1

    key = jax.random.PRNGKey(0)
    x = jax.random.normal(key, (B, S, D), dtype=jnp.float32)
    pe = make_sinusoidal_pe(MAX_LEN, D, dtype=jnp.float32)
    ref = x + pe[None, :S, :]

    # Eval-mode check (dropout off): kernel must equal x + pe exactly.
    out_eval = positional_encoding_forward(x, pe, seed=0, p=P_DROP, train=False)
    out_eval = jax.block_until_ready(out_eval)
    assert out_eval.shape == (B, S, D)
    assert jnp.allclose(out_eval, ref, atol=1e-6), "eval-mode mismatch"

    # Train-mode check: every element is either 0 (dropped) or (x+pe)/(1-p).
    out_train = positional_encoding_forward(x, pe, seed=1234, p=P_DROP, train=True)
    out_train = jax.block_until_ready(out_train)
    assert out_train.shape == (B, S, D)
    ref_scaled = ref / (1.0 - P_DROP)
    is_zero = out_train == 0.0
    is_kept = jnp.isclose(out_train, ref_scaled, atol=1e-5, rtol=1e-5)
    assert bool(jnp.all(is_zero | is_kept)), "train-mode values not in {0, (x+pe)/(1-p)}"
    keep_frac = float(jnp.mean(is_kept.astype(jnp.float32)))
    assert 0.80 < keep_frac < 0.98, f"dropout keep fraction off: {keep_frac}"

    # Different seeds must give different masks (callers vary seed per layer/step).
    out_train2 = positional_encoding_forward(x, pe, seed=999, p=P_DROP, train=True)
    out_train2 = jax.block_until_ready(out_train2)
    assert bool(jnp.any(out_train != out_train2)), "dropout mask not seed-dependent"

    print("KERNEL_OK")
</pallas_src>

<mosaic_0001>
module attributes {stable_mosaic.version = 11 : i64} {
  func.func @_pe_dropout_kernel(%arg0: i32, %arg1: memref<1xi32, #tpu.memory_space<smem>>, %arg2: memref<2x1280xf32, #tpu.memory_space<vmem>>, %arg3: memref<1x1280xf32, #tpu.memory_space<vmem>>, %arg4: memref<2x1280xf32, #tpu.memory_space<vmem>>) attributes {dimension_semantics = [#tpu.dimension_semantics<parallel>], iteration_bounds = array<i64: 1>, scalar_prefetch = 1 : i64, scratch_operands = 0 : i64, tpu.core_type = #tpu.core_type<tc>, window_params = [{transform_indices = @transform_0, window_bounds = array<i64: 2, 1280>}, {pipeline_mode = #tpu.pipeline_mode<synchronous>, transform_indices = @transform_1, window_bounds = array<i64: 1, 1280>}, {transform_indices = @transform_2, window_bounds = array<i64: 2, 1280>}]} {
    %c0 = arith.constant 0 : index
    %c0_0 = arith.constant 0 : index
    %0 = vector.load %arg2[%c0, %c0_0] : memref<2x1280xf32, #tpu.memory_space<vmem>>, vector<2x1280xf32>
    %c0_1 = arith.constant 0 : index
    %c0_2 = arith.constant 0 : index
    %1 = vector.load %arg3[%c0_1, %c0_2] : memref<1x1280xf32, #tpu.memory_space<vmem>>, vector<1x1280xf32>
    %2 = vector.broadcast %1 : vector<1x1280xf32> to vector<2x1280xf32>
    %3 = arith.addf %0, %2 : vector<2x1280xf32>
    %c0_3 = arith.constant 0 : index
    %c0_4 = arith.constant 0 : index
    %4 = vector.load %arg4[%c0_3, %c0_4] : memref<2x1280xf32, #tpu.memory_space<vmem>>, vector<2x1280xf32>
    tpu.vector_store %arg4[%c0_3, %c0_4], %3 {strides = array<i32>} : memref<2x1280xf32, #tpu.memory_space<vmem>>, vector<2x1280xf32>,
    return
  }
  func.func @transform_0(%arg0: i32, %arg1: memref<1xi32, #tpu.memory_space<smem>>) -> (i32, i32) {
    %c0_i32 = arith.constant 0 : i32
    %c0_i32_0 = arith.constant 0 : i32
    return %arg0, %c0_i32 : i32, i32
  }
  func.func @transform_1(%arg0: i32, %arg1: memref<1xi32, #tpu.memory_space<smem>>) -> (i32, i32) {
    %c0_i32 = arith.constant 0 : i32
    %c0_i32_0 = arith.constant 0 : i32
    %c0_i32_1 = arith.constant 0 : i32
    return %c0_i32, %c0_i32_0 : i32, i32
  }
  func.func @transform_2(%arg0: i32, %arg1: memref<1xi32, #tpu.memory_space<smem>>) -> (i32, i32) {
    %c0_i32 = arith.constant 0 : i32
    %c0_i32_0 = arith.constant 0 : i32
    return %arg0, %c0_i32 : i32, i32
  }
}

</mosaic_0001>

<bundles_post_ra>
// kernel: tpu_custom_call.1
= control target key start
LH: loop header
LB: loop body
LE: loop exit
PB: predicated region body
PF: predicated region fallthrough
CT: control target
= control target key end

     0   :  { %9 = vsyncpa [#allocation5], 0  ;;  %s223_s0 = inlined_call_operand.<no memory space> [shape: s32[1], index: 0, kind: input, shape index: {}]   ;;  %s224_s1 = inlined_call_operand.hbm [shape: f32[2,1280], index: 1, kind: input, shape index: {}]   ;;  %s225_s2 = inlined_call_operand.hbm [shape: f32[1,1280], index: 2, kind: input, shape index: {}]   ;;  %s226_s3 = inlined_call_operand.hbm [shape: f32[2,1280], index: 3, kind: output, shape index: {}]  }
   0x1   :  { %10 = vsyncpa [#allocation8], 0 }
   0x2   :  { %11 = vsyncpa [#allocation6], 0  ;;  %s17_s14 = sshll.u32 %s224_s1, 4  ;;  %s184_s15 = smov [#allocation4]   ;;  %s18_s14 = int_to_ptr.hbm [resolvable:$true] %s17_s14 }
   0x3   :  { %s19_s16 = sshll.u32 %s184_s15, 4  ;;  %s28_s18 = sshll.u32 %s225_s2, 4  ;;  %s20_s16 = int_to_ptr.vmem [resolvable:$true] %s19_s16  ;;  %s29_s18 = int_to_ptr.hbm [resolvable:$true] %s28_s18 }
   0x4   :  { %22 = dma.hbm_to_vmem [thread:$0]  %s18_s14, 320, %s20_s16, [#allocation5]  }
   0x5   :  { %s185_s19 = smov [#allocation7]  }
   0x6   :  { %s30_s20 = sshll.u32 %s185_s19, 4  ;;  %s31_s20 = int_to_ptr.vmem [resolvable:$true] %s30_s20 }
   0x7   :  { %33 = dma.hbm_to_vmem [thread:$0]  %s29_s18, 160, %s31_s20, [#allocation8]  }
   0x8   :  { %178 = dma.done.wait [#allocation5], 320  }
   0x9   :  { %179 = vsyncadd [#allocation5], 4294966976 }
   0xa   :  { %180 = dma.done.wait [#allocation8], 160  }
   0xb   :  { %181 = vsyncadd [#allocation8], 4294967136  ;;  %v45_v0 = vld [vmem:[#allocation7] sm:$0xff]  ;;  %vm66_vm0 = vcmask 1041408   ;;  %vm68_vm1 = vcmask 1045508   ;;  %vm70_vm2 = vcmask 1043456  }
   0xc   :  { %v49_v1 = vperm.slane %v45_v0, 0  ;;  %v50_v2 = vperm.slane %v45_v0, 1  ;;  %v51_v3 = vperm.slane %v45_v0, 2  ;;  %v52_v4 = vperm.slane %v45_v0, 3  ;;  %v46_v9 = vld [vmem:[#allocation7 + $0x8] sm:$0x3] }
   0xd   :  { %v53_v5 = vperm.slane %v45_v0, 4  ;;  %v54_v6 = vperm.slane %v45_v0, 5  ;;  %v55_v7 = vperm.slane %v45_v0, 6  ;;  %v56_v8 = vperm.slane %v45_v0, 7  ;;  %v42_v14 = vld [vmem:[#allocation4] sm:$0xff]  ;;  %v43_v21 = vld [vmem:[#allocation4 + $0x8] sm:$0xff] }
   0xe   :  { %v59_v10 = vrot.slane %v50_v2, 6  ;;  %v60_v11 = vrot.slane %v51_v3, 4  ;;  %v61_v12 = vrot.slane %v52_v4, 2  ;;  %v57_v13 = vperm.slane %v46_v9, 0  ;;  %v44_v25 = vld [vmem:[#allocation4 + $0x10] sm:$0xf] }
   0xf   :  { %v62_v15 = vrot.slane %v54_v6, 6  ;;  %v63_v16 = vrot.slane %v55_v7, 4  ;;  %v64_v17 = vrot.slane %v56_v8, 2  ;;  %v58_v18 = vperm.slane %v46_v9, 1  ;;  %s186_s1 = smov [#allocation9]   ;;  %s92_s23 = sshll.u32 %s226_s3, 4  ;;  %s93_s23 = int_to_ptr.hbm [resolvable:$true] %s92_s23 }
  0x10   :  { %v67_v19 = vsel %vm66_vm0, %v49_v1, %v59_v10  ;;  %v69_v20 = vsel %vm68_vm1, %v60_v11, %v61_v12  ;;  %s90_s2 = sshll.u32 %s186_s1, 4  ;;  %s91_s2 = int_to_ptr.vmem [resolvable:$true] %s90_s2 }
  0x11   :  { %v71_v22 = vsel %vm70_vm2, %v67_v19, %v69_v20  ;;  %v72_v23 = vsel %vm66_vm0, %v53_v5, %v62_v15  ;;  %v73_v24 = vsel %vm68_vm1, %v63_v16, %v64_v17  ;;  %v65_v26 = vrot.slane %v58_v18, 6 }
  0x12   :  { %v79_v27 = vadd.f32 %v71_v22, %v42_v14  ;;  %v74_v28 = vsel %vm70_vm2, %v72_v23, %v73_v24 }
  0x13   :  { %v80_v29 = vadd.f32 %v74_v28, %v43_v21  ;;  %v75_v30 = vsel %vm66_vm0, %v57_v13, %v65_v26 }
  0x14   :  { %82 = vst [vmem:[#allocation9] sm:$0xff] %v79_v27  ;;  %v81_v31 = vadd.f32 %v75_v30, %v44_v25 }
  0x15   :  { %83 = vst [vmem:[#allocation9 + $0x8] sm:$0xff] %v80_v29 }
  0x16   :  { %84 = vst [vmem:[#allocation9 + $0x10] sm:$0xf] %v81_v31 }
  0x17   :  { %95 = dma.vmem_to_hbm [thread:$0]  %s91_s2, 320, %s93_s23, [#allocation6]  }
  0x18   :  { %182 = dma.done.wait [#allocation6], 320  }
  0x19   :  { %183 = vsyncadd [#allocation6], 4294966976 }
  0x1a   :  { %100 = vsyncpa [#allocation5], 1 }
  0x1b   :  { %101 = vsyncpa [#allocation8], 1 }
  0x1c   :  { %102 = vsyncpa [#allocation6], 1 }

</bundles_post_ra>
